<compile_context>
chip_gen: v7x
topology: tpu7x:2x2x1
jax: 0.10.0
libtpu: 0.0.40
codegen_flags: <defaults>
</compile_context>

<pallas_src>
import jax
import jax.numpy as jnp
from jax import lax
from jax.experimental import pallas as pl
from jax.experimental.pallas import tpu as pltpu


def _logreg_kernel(x_ref, w_ref, b_ref, o_ref):
    # x_ref: [TB, D] input tile (VMEM)
    # w_ref: [1, D]  weights in PyTorch nn.Linear layout (VMEM, resident)
    # b_ref: [1, 1]  bias scalar (SMEM)
    # o_ref: [1, TB] lane-dense output tile (batch on the lane axis)
    x = x_ref[...].astype(jnp.float32)
    w = w_ref[...]
    # [1, D] contracted with [TB, D] on D  ->  [1, TB]  (MXU, f32 accumulate)
    z = lax.dot_general(
        w, x,
        dimension_numbers=(((1,), (1,)), ((), ())),
        preferred_element_type=jnp.float32,
    )
    z = z + b_ref[0, 0]
    o_ref[...] = (1.0 / (1.0 + jnp.exp(-z))).astype(o_ref.dtype)


def binary_logistic_regression(x, weight, bias, *, tile_rows=1024):
    """sigmoid(x @ weight.T + bias).

    x: [B, D], weight: [1, D] (PyTorch nn.Linear layout), bias: [1].
    Returns [B, 1] float32.
    """
    B, D = x.shape

    # Lane-padded bytes of one f32 row in VMEM (last dim pads to 128 lanes).
    d_pad = ((D + 127) // 128) * 128
    # Keep each x buffer <= ~8 MiB so 2 (double-buffered) tiles + weight +
    # output fit comfortably under a 32 MiB scoped-VMEM limit on every gen.
    vmem_budget_per_buf = 8 * 1024 * 1024
    tb_cap = max(128, (vmem_budget_per_buf // (d_pad * 4)) // 128 * 128)
    tb = min(tile_rows, tb_cap)

    b_pad8 = ((B + 7) // 8) * 8
    if b_pad8 <= tb:
        # Small batch: a single block covering the sublane-padded batch
        # (block == full array extent, so (8,128) divisibility is not needed).
        tb = b_pad8
        b_padded = b_pad8
    else:
        # Tiled path: TB is a multiple of 128 (legal sublane / lane-dense out).
        b_padded = ((B + tb - 1) // tb) * tb

    if b_padded != B:
        x = jnp.pad(x, ((0, b_padded - B), (0, 0)))

    w = weight.astype(jnp.float32)                  # [1, D], tiny
    b2d = bias.reshape(1, 1).astype(jnp.float32)    # [1, 1], SMEM scalar

    grid = (b_padded // tb,)

    out = pl.pallas_call(
        _logreg_kernel,
        out_shape=jax.ShapeDtypeStruct((1, b_padded), jnp.float32),
        grid_spec=pltpu.PrefetchScalarGridSpec(
            num_scalar_prefetch=0,
            grid=grid,
            in_specs=[
                pl.BlockSpec((tb, D), lambda i: (i, 0)),             # x tile
                pl.BlockSpec((1, D), lambda i: (0, 0)),              # weight (resident)
                pl.BlockSpec(memory_space=pltpu.MemorySpace.SMEM),   # bias
            ],
            out_specs=pl.BlockSpec((1, tb), lambda i: (0, i)),       # lane-dense
        ),
        compiler_params=pltpu.CompilerParams(
            dimension_semantics=("parallel",),
            vmem_limit_bytes=32 * 1024 * 1024,
        ),
    )(x, w, b2d)

    return out[0, :B].reshape(B, 1)


if __name__ == "__main__":
    key = jax.random.PRNGKey(0)
    kx, kw, kb, kx2 = jax.random.split(key, 4)

    batch, n_inputs = 8, 32
    x = jax.random.normal(kx, (batch, n_inputs), dtype=jnp.float32)
    # Deterministic "nn.Linear(n_inputs, 1)" parameters (uniform like PyTorch).
    bound = 1.0 / (n_inputs ** 0.5)
    weight = jax.random.uniform(kw, (1, n_inputs), jnp.float32, -bound, bound)
    bias = jax.random.uniform(kb, (1,), jnp.float32, -bound, bound)

    # Small-shape run (single block path).
    y = binary_logistic_regression(x, weight, bias)
    jax.block_until_ready(y)
    y_ref = jax.nn.sigmoid(x @ weight.T + bias)
    assert y.shape == (batch, 1)
    assert jnp.allclose(y, y_ref, atol=1e-5), "mismatch vs reference (small)"

    # Also exercise the tiled / padded multi-block path.
    big_batch = 2500
    x_big = jax.random.normal(kx2, (big_batch, n_inputs), dtype=jnp.float32)
    y_big = binary_logistic_regression(x_big, weight, bias, tile_rows=1024)
    jax.block_until_ready(y_big)
    y_big_ref = jax.nn.sigmoid(x_big @ weight.T + bias)
    assert y_big.shape == (big_batch, 1)
    assert jnp.allclose(y_big, y_big_ref, atol=1e-5), "mismatch vs reference (tiled)"

    print("KERNEL_OK")
</pallas_src>

<mosaic_0001>
module attributes {stable_mosaic.version = 11 : i64} {
  func.func @_logreg_kernel(%arg0: i32, %arg1: memref<8x32xf32, #tpu.memory_space<vmem>>, %arg2: memref<1x32xf32, #tpu.memory_space<vmem>>, %arg3: memref<1x1xf32, #tpu.memory_space<smem>>, %arg4: memref<1x8xf32, #tpu.memory_space<vmem>>) attributes {dimension_semantics = [#tpu.dimension_semantics<parallel>], iteration_bounds = array<i64: 1>, scalar_prefetch = 0 : i64, scratch_operands = 0 : i64, tpu.core_type = #tpu.core_type<tc>, window_params = [{transform_indices = @transform_0, window_bounds = array<i64: 8, 32>}, {pipeline_mode = #tpu.pipeline_mode<synchronous>, transform_indices = @transform_1, window_bounds = array<i64: 1, 32>}, {transform_indices = @transform_2, window_bounds = array<i64: 1, 1>}, {transform_indices = @transform_3, window_bounds = array<i64: 1, 8>}]} {
    %c0 = arith.constant 0 : index
    %c0_0 = arith.constant 0 : index
    %0 = vector.load %arg1[%c0, %c0_0] : memref<8x32xf32, #tpu.memory_space<vmem>>, vector<8x32xf32>
    %c0_1 = arith.constant 0 : index
    %c0_2 = arith.constant 0 : index
    %1 = vector.load %arg2[%c0_1, %c0_2] : memref<1x32xf32, #tpu.memory_space<vmem>>, vector<1x32xf32>
    %cst = arith.constant dense<0.000000e+00> : vector<1x8xf32>
    %2 = tpu.matmul %1, %0, %cst {dimension_numbers = #tpu.dot_dimension_numbers<[1], [1], [0], [0], [0, 0, 1, 0], [], []>} : vector<1x32xf32>, vector<8x32xf32>, vector<1x8xf32> -> vector<1x8xf32>
    %c0_3 = arith.constant 0 : index
    %c0_4 = arith.constant 0 : index
    %3 = memref.load %arg3[%c0_3, %c0_4] : memref<1x1xf32, #tpu.memory_space<smem>>
    %4 = vector.broadcast %3 : f32 to vector<1x8xf32>
    %5 = arith.addf %2, %4 : vector<1x8xf32>
    %cst_5 = arith.constant 0.000000e+00 : f32
    %6 = vector.broadcast %cst_5 : f32 to vector<1x8xf32>
    %7 = arith.subf %6, %5 : vector<1x8xf32>
    %8 = math.exp %7 : vector<1x8xf32>
    %cst_6 = arith.constant 1.000000e+00 : f32
    %9 = vector.broadcast %cst_6 : f32 to vector<1x8xf32>
    %10 = arith.addf %9, %8 : vector<1x8xf32>
    %cst_7 = arith.constant 1.000000e+00 : f32
    %11 = vector.broadcast %cst_7 : f32 to vector<1x8xf32>
    %12 = arith.divf %11, %10 : vector<1x8xf32>
    %c0_8 = arith.constant 0 : index
    %c0_9 = arith.constant 0 : index
    %13 = vector.load %arg4[%c0_8, %c0_9] : memref<1x8xf32, #tpu.memory_space<vmem>>, vector<1x8xf32>
    tpu.vector_store %arg4[%c0_8, %c0_9], %12 {strides = array<i32>} : memref<1x8xf32, #tpu.memory_space<vmem>>, vector<1x8xf32>,
    return
  }
  func.func @transform_0(%arg0: i32) -> (i32, i32) {
    %c0_i32 = arith.constant 0 : i32
    %c0_i32_0 = arith.constant 0 : i32
    return %arg0, %c0_i32 : i32, i32
  }
  func.func @transform_1(%arg0: i32) -> (i32, i32) {
    %c0_i32 = arith.constant 0 : i32
    %c0_i32_0 = arith.constant 0 : i32
    %c0_i32_1 = arith.constant 0 : i32
    return %c0_i32, %c0_i32_0 : i32, i32
  }
  func.func @transform_2(%arg0: i32) -> (i32, i32) {
    %c0_i32 = arith.constant 0 : i32
    %c0_i32_0 = arith.constant 0 : i32
    %c0_i32_1 = arith.constant 0 : i32
    return %c0_i32, %c0_i32_0 : i32, i32
  }
  func.func @transform_3(%arg0: i32) -> (i32, i32) {
    %c0_i32 = arith.constant 0 : i32
    %c0_i32_0 = arith.constant 0 : i32
    return %c0_i32, %arg0 : i32, i32
  }
}

</mosaic_0001>

<bundles_post_ra>
// kernel: tpu_custom_call.1
= control target key start
LH: loop header
LB: loop body
LE: loop exit
PB: predicated region body
PF: predicated region fallthrough
CT: control target
= control target key end

     0   :  { %9 = vsyncpa [#allocation4], 0  ;;  %s251_s0 = inlined_call_operand.hbm [shape: f32[8,32], index: 0, kind: input, shape index: {}]   ;;  %s252_s1 = inlined_call_operand.vmem [shape: f32[1,32], index: 1, kind: input, shape index: {}]   ;;  %s253_s2 = inlined_call_operand.<no memory space> [shape: f32[1,1], index: 2, kind: input, shape index: {}]   ;;  %s254_s3 = inlined_call_operand.hbm [shape: f32[1,8], index: 3, kind: output, shape index: {}]  }
   0x1   :  { %10 = vsyncpa [#allocation5], 0  ;;  %s197_s12 = smov [#allocation3]   ;;  %s149_s16 = scalar_lea.hbm %s251_s0, 128 }
   0x2   :  { %s17_s13 = sshll.u32 %s197_s12, 4  ;;  %p150_p0 = scmp.ne.s32.totalorder %s251_s0, %s149_s16  ;;  %s18_s13 = int_to_ptr.vmem [resolvable:$true] %s17_s13 }
   0x3   :  { %p153_p1 = scmp.lt.u32.totalorder %s149_s16, %s251_s0 }
   0x5   :  { %p155_p2 = pnand %p153_p1, %p150_p0 }
   0x7   :  { %158 = shalt.err (!%p155_p2)
}
   0x8   :  { %s159_s21 = scalar_lea.vmem %s18_s13, 128  ;;  %p164_p4 = scmp.lt.s32.totalorder %s18_s13, %s18_s13 }
   0x9   :  { %p160_p3 = scmp.ne.s32.totalorder %s18_s13, %s159_s21  ;;  %p165_p5 = scmp.lt.s32.totalorder %s159_s21, %s159_s21 }
   0xb   :  { %p166_p6 = por %p165_p5, %p164_p4 }
   0xd   :  { %p167_p7 = pnand %p166_p6, %p160_p3 }
   0xf   :  { %170 = shalt.err (!%p167_p7)
}
  0x10   :  { %20 = dma.hbm_to_vmem [thread:$0]  %s251_s0, 128, %s18_s13, [#allocation4]  }
  0x11   :  { %193 = dma.done.wait [#allocation4], 128  }
  0x12   :  { %194 = vsyncadd [#allocation4], 4294967168  ;;  %v198_v0 = vmov 0.0   ;;  %vm199_vm0 = vmmov 0   ;;  %vm32_vm1 = vcmask 261120   ;;  %v28_v1 = vld [vmem:[#allocation3] sm:$0xff]  ;;  %v31_v3 = vstv %s253_s2 }
  0x13   :  { %136 = vmatprep.subr.mxu0 %v198_v0  ;;  %138 = vmatprep.mubr.msk.f32.mxu0 %vm199_vm0, %v198_v0  ;;  %v29_v2 = vld [vmem:[%s252_s1] sm:$0x1]  ;;  %s200_s0 = smov [#allocation6]   ;;  %vm115_vm2 = vcmask 57344  }
  0x14   :  { %137 = vmatpush3.xpose.msk.msra.mxu0 %vm32_vm1, %v28_v1  ;;  %s123_s28 = sshll.u32 %s200_s0, 4  ;;  %s124_s28 = int_to_ptr.vmem [resolvable:$true] %s123_s28 }
  0x15   :  { %s171_s1 = scalar_lea.vmem %s124_s28, 16  ;;  %s175_s29 = scalar_lea.vmem %s124_s28, 32 }
  0x16   :  { %p172_p8 = scmp.ne.s32.totalorder %s124_s28, %s171_s1  ;;  %p176_p9 = scmp.lt.s32.totalorder %s124_s28, %s124_s28 }
  0x17   :  { %139 = vmatmul.mubr.msk.f32.vlgmr.msra.gmra.mrb[0].mxu0 %vm32_vm1, %v29_v2  ;;  %p177_p10 = scmp.lt.s32.totalorder %s175_s29, %s171_s1 }
  0x19   :  { %p178_p11 = por %p177_p10, %p176_p9 }
  0x1b   :  { %p179_p12 = pnand %p178_p11, %p172_p8 }
  0xea   :  { %v105_v4 = vpop.f32.mrb[0].mxu0 }
  0xeb   :  { %v106_v5 = vadd.f32 %v105_v4, %v31_v3  ;;  %v140_v6 = vpop.f32.mrb[1].mxu0 }
  0xed   :  { %v109_v7 = vsub.f32 0.0, %v106_v5 }
  0xef   :  { %v110_v8 = vmul.f32 1.442695, %v109_v7 }
  0xf1   :  { %145 = vpow2.f32 %v110_v8 }
  0xfb   :  { %v146_v9 = vpop.eup %145 }
  0xfc   :  { %v112_v10 = vadd.f32 1.0, %v146_v9 }
  0xfe   :  { %147 = vrcp.f32 %v112_v10 }
 0x108   :  { %v148_v11 = vpop.eup %147 }
 0x109   :  { %116 = vst.msk [vmem:[#allocation6] sm:$0x1] %vm115_vm2, %v148_v11 }
 0x10a   :  { %182 = shalt.err (!%p179_p12)
}
 0x10b   :  { %s183_s4 = scalar_lea.hbm %s254_s3, 16 }
 0x10c   :  { %p184_p13 = scmp.ne.s32.totalorder %s254_s3, %s183_s4  ;;  %p187_p0 = scmp.lt.u32.totalorder %s183_s4, %s254_s3 }
 0x10e   :  { %p189_p1 = pnand %p187_p0, %p184_p13 }
 0x110   :  { %192 = shalt.err (!%p189_p1)
}
 0x111   :  { %126 = dma.vmem_to_hbm [thread:$0]  %s124_s28, 16, %s254_s3, [#allocation5]  }
 0x112   :  { %195 = dma.done.wait [#allocation5], 16  }
 0x113   :  { %196 = vsyncadd [#allocation5], 4294967280 }
 0x114   :  { %130 = vsyncpa [#allocation4], 1 }
 0x115   :  { %131 = vsyncpa [#allocation5], 1 }

</bundles_post_ra>
